<compile_context>
chip_gen: v7x
topology: tpu7x:2x2x1
jax: 0.10.0
libtpu: 0.0.40
codegen_flags: <defaults>
</compile_context>

<pallas_src>
import jax
import jax.numpy as jnp
from jax.experimental import pallas as pl
from jax.experimental.pallas import tpu as pltpu


def _round_up(a, b):
    return (a + b - 1) // b * b


def _pair(v):
    if isinstance(v, (tuple, list)):
        return (int(v[0]), int(v[1]))
    return (int(v), int(v))


# ---------------------------------------------------------------------------
# Pallas kernel: C[i, j] = sum_k A[i, k] * B[k, j] + bias[j], tiled (tm, tn, tk)
# ---------------------------------------------------------------------------
def _gemm_bias_kernel(x_ref, w_ref, b_ref, o_ref, acc_ref):
    @pl.when(pl.program_id(2) == 0)
    def _init():
        # Fold the bias into the accumulator init: the bias add is free and
        # hoisted out of the K loop (no per-iteration broadcast_in_dim).
        acc_ref[...] = jnp.broadcast_to(
            b_ref[...].astype(jnp.float32), acc_ref.shape)

    acc_ref[...] += jnp.dot(x_ref[...], w_ref[...],
                            preferred_element_type=jnp.float32)

    @pl.when(pl.program_id(2) == pl.num_programs(2) - 1)
    def _store():
        o_ref[...] = acc_ref[...].astype(o_ref.dtype)


def _gemm_bias(patches, w2d, bias_row, out_dtype, *, tm=512):
    """patches: [M, K]; w2d: [K, Co]; bias_row: [1, Co] -> out [M, Co]."""
    M, K = patches.shape
    _, Co = w2d.shape

    # ---- MXU / lane-friendly padding & tile selection ----------------------
    Co_pad = _round_up(Co, 128)                    # lane-dense output (unmasked vst)
    tn = 256 if (Co_pad % 256 == 0) else 128       # 256-aligned output tile when possible

    K_pad = _round_up(K, 8)
    if K_pad > 512:
        tk = 256                                   # tile the contraction dim
        K_pad = _round_up(K, tk)
    else:
        tk = K_pad                                 # single K tile (full array dim)

    tm = min(tm, _round_up(M, 8))                  # row tile (512 amortizes pipeline overhead)
    M_pad = _round_up(M, tm)

    p = patches if (M_pad == M and K_pad == K) else jnp.pad(
        patches, ((0, M_pad - M), (0, K_pad - K)))
    w = w2d if (K_pad == K and Co_pad == Co) else jnp.pad(
        w2d, ((0, K_pad - K), (0, Co_pad - Co)))
    b = bias_row if Co_pad == Co else jnp.pad(bias_row, ((0, 0), (0, Co_pad - Co)))

    grid = (M_pad // tm, Co_pad // tn, K_pad // tk)

    out = pl.pallas_call(
        _gemm_bias_kernel,
        out_shape=jax.ShapeDtypeStruct((M_pad, Co_pad), out_dtype),
        grid_spec=pltpu.PrefetchScalarGridSpec(
            num_scalar_prefetch=0,
            grid=grid,
            in_specs=[
                pl.BlockSpec((tm, tk), lambda i, j, k: (i, k)),   # patches
                pl.BlockSpec((tk, tn), lambda i, j, k: (k, j)),   # weight
                pl.BlockSpec((1, tn), lambda i, j, k: (0, j)),    # bias row
            ],
            out_specs=pl.BlockSpec((tm, tn), lambda i, j, k: (i, j)),
            scratch_shapes=[pltpu.VMEM((tm, tn), jnp.float32)],
        ),
        compiler_params=pltpu.CompilerParams(
            # rows / Co shard across TensorCores (v7x megacore); K is the reduction.
            dimension_semantics=("parallel", "parallel", "arbitrary")),
    )(p, w, b)

    return out[:M, :Co]


# ---------------------------------------------------------------------------
# JAX-side im2col + wrapper (NCHW in / NCHW out, PyTorch F.conv2d semantics)
# ---------------------------------------------------------------------------
def _im2col(x_pad, kh, kw, sh, sw, dh, dw, Ho, Wo):
    """x_pad: [N, C, Hp, Wp] (already spatially padded) -> [N*Ho*Wo, C*kh*kw],
    K ordered as (c, kh, kw) to match weight.reshape(Co, C*kh*kw)."""
    N, C, _, _ = x_pad.shape
    cols = []
    for i in range(kh):
        for j in range(kw):
            hs, ws = i * dh, j * dw
            sl = x_pad[:, :, hs:hs + (Ho - 1) * sh + 1:sh,
                             ws:ws + (Wo - 1) * sw + 1:sw]   # [N, C, Ho, Wo]
            cols.append(sl)
    p = jnp.stack(cols, axis=2)                  # [N, C, kh*kw, Ho, Wo]
    p = p.transpose(0, 3, 4, 1, 2)               # [N, Ho, Wo, C, kh*kw]
    return p.reshape(N * Ho * Wo, C * kh * kw)


def masked_conv2d_forward(x, weight, bias=None, stride=1, padding=0,
                          dilation=1, groups=1, *,
                          compute_dtype=jnp.float32, tm=512):
    """Forward of MaskedConv2d == F.conv2d(x, weight, bias, ...) with the
    LULA-expanded parameters.

    x:      [N, Ci, H, W] (NCHW, like PyTorch)
    weight: [Co, Ci // groups, kh, kw]
    bias:   [Co] or None
    """
    sh, sw = _pair(stride)
    ph, pw = _pair(padding)
    dh, dw = _pair(dilation)

    N, Ci, H, W = x.shape
    Co, Ci_g, kh, kw = weight.shape
    assert Ci == Ci_g * groups, "in_channels must equal groups * weight.shape[1]"
    assert Co % groups == 0
    Co_g = Co // groups

    Ho = (H + 2 * ph - dh * (kh - 1) - 1) // sh + 1
    Wo = (W + 2 * pw - dw * (kw - 1) - 1) // sw + 1

    x_pad = jnp.pad(x, ((0, 0), (0, 0), (ph, ph), (pw, pw)))
    if bias is None:
        bias = jnp.zeros((Co,), x.dtype)

    group_outs = []
    for g in range(groups):
        xg = x_pad[:, g * Ci_g:(g + 1) * Ci_g]
        wg = weight[g * Co_g:(g + 1) * Co_g]                    # [Co_g, Ci_g, kh, kw]
        bg = bias[g * Co_g:(g + 1) * Co_g]

        patches = _im2col(xg, kh, kw, sh, sw, dh, dw, Ho, Wo)   # [M, K]
        w2d = wg.reshape(Co_g, Ci_g * kh * kw).T                # [K, Co_g]

        # Optional bf16 feed for the MXU (set compute_dtype=jnp.bfloat16);
        # accumulation stays f32 inside the kernel either way.
        patches = patches.astype(compute_dtype)
        w2d = w2d.astype(compute_dtype)
        b_row = bg.reshape(1, Co_g).astype(jnp.float32)

        y = _gemm_bias(patches, w2d, b_row, x.dtype, tm=tm)     # [M, Co_g] lane-dense
        y = y.reshape(N, Ho, Wo, Co_g).transpose(0, 3, 1, 2)    # NCHW in the XLA wrapper
        group_outs.append(y)

    if groups == 1:
        return group_outs[0]
    return jnp.concatenate(group_outs, axis=1)


if __name__ == "__main__":
    key = jax.random.PRNGKey(0)
    k_wb, k_bb, k_w, k_b, k_x = jax.random.split(key, 5)

    # Base conv: 3 -> 5 channels, 3x3, stride 1, padding 1.
    # LULA expansion m_in=1, m_out=3  =>  expanded conv is 4 -> 8 channels.
    n_in, n_out, ksz = 3, 5, 3
    m_in, m_out = 1, 3
    stride, padding, dilation, groups = (1, 1), (1, 1), (1, 1), 1

    W_base = jax.random.normal(k_wb, (n_out, n_in, ksz, ksz), jnp.float32)
    b_base = jax.random.normal(k_bb, (n_out,), jnp.float32)

    # LULA-expanded weight: base block top-left, zeros in [0:n_out, n_in:], random elsewhere.
    W = jax.random.normal(k_w, (n_out + m_out, n_in + m_in, ksz, ksz), jnp.float32)
    W = W.at[:n_out, :n_in].set(W_base)
    W = W.at[:n_out, n_in:].set(0.0)
    b = jax.random.normal(k_b, (n_out + m_out,), jnp.float32)
    b = b.at[:n_out].set(b_base)

    x = jax.random.normal(k_x, (2, n_in + m_in, 16, 16), jnp.float32)   # [2, 4, 16, 16]

    out = masked_conv2d_forward(x, W, b, stride, padding, dilation, groups)
    out = jax.block_until_ready(out)

    # Reference: XLA conv (same cross-correlation semantics as F.conv2d).
    ref = jax.lax.conv_general_dilated(
        x, W, window_strides=stride,
        padding=[(padding[0], padding[0]), (padding[1], padding[1])],
        rhs_dilation=dilation, feature_group_count=groups,
        dimension_numbers=("NCHW", "OIHW", "NCHW"))
    ref = ref + b[None, :, None, None]

    err = float(jnp.max(jnp.abs(out - ref)))
    scale = float(jnp.max(jnp.abs(ref))) + 1e-6
    assert out.shape == ref.shape and err <= 2e-2 * scale, (
        f"mismatch: max|diff|={err:.3e}, max|ref|={scale:.3e}")
    print("KERNEL_OK")
</pallas_src>

<mosaic_0001>
module attributes {stable_mosaic.version = 11 : i64} {
  func.func @_gemm_bias_kernel(%arg0: i32, %arg1: i32, %arg2: i32, %arg3: memref<512x40xf32, #tpu.memory_space<vmem>>, %arg4: memref<40x128xf32, #tpu.memory_space<vmem>>, %arg5: memref<1x128xf32, #tpu.memory_space<vmem>>, %arg6: memref<512x128xf32, #tpu.memory_space<vmem>>, %arg7: memref<512x128xf32, #tpu.memory_space<vmem>>) attributes {dimension_semantics = [#tpu.dimension_semantics<parallel>, #tpu.dimension_semantics<parallel>, #tpu.dimension_semantics<arbitrary>], iteration_bounds = array<i64: 1, 1, 1>, scalar_prefetch = 0 : i64, scratch_operands = 1 : i64, tpu.core_type = #tpu.core_type<tc>, window_params = [{transform_indices = @transform_0, window_bounds = array<i64: 512, 40>}, {transform_indices = @transform_1, window_bounds = array<i64: 40, 128>}, {transform_indices = @transform_2, window_bounds = array<i64: 1, 128>}, {transform_indices = @transform_3, window_bounds = array<i64: 512, 128>}]} {
    %c0_i32 = arith.constant 0 : i32
    %0 = arith.cmpi eq, %arg2, %c0_i32 : i32
    %1 = arith.extui %0 : i1 to i32
    %c0_i32_0 = arith.constant 0 : i32
    %2 = arith.cmpi ne, %1, %c0_i32_0 : i32
    scf.if %2 {
      %c0_10 = arith.constant 0 : index
      %c0_11 = arith.constant 0 : index
      %12 = vector.load %arg5[%c0_10, %c0_11] : memref<1x128xf32, #tpu.memory_space<vmem>>, vector<1x128xf32>
      %13 = vector.shape_cast %12 : vector<1x128xf32> to vector<1x128xf32>
      %14 = vector.broadcast %13 : vector<1x128xf32> to vector<512x128xf32>
      %c0_12 = arith.constant 0 : index
      %c0_13 = arith.constant 0 : index
      %15 = vector.load %arg7[%c0_12, %c0_13] : memref<512x128xf32, #tpu.memory_space<vmem>>, vector<512x128xf32>
      tpu.vector_store %arg7[%c0_12, %c0_13], %14 {strides = array<i32>} : memref<512x128xf32, #tpu.memory_space<vmem>>, vector<512x128xf32>,
    } else {
    }
    %c0 = arith.constant 0 : index
    %c0_1 = arith.constant 0 : index
    %3 = vector.load %arg7[%c0, %c0_1] : memref<512x128xf32, #tpu.memory_space<vmem>>, vector<512x128xf32>
    %c0_2 = arith.constant 0 : index
    %c0_3 = arith.constant 0 : index
    %4 = vector.load %arg3[%c0_2, %c0_3] : memref<512x40xf32, #tpu.memory_space<vmem>>, vector<512x40xf32>
    %c0_4 = arith.constant 0 : index
    %c0_5 = arith.constant 0 : index
    %5 = vector.load %arg4[%c0_4, %c0_5] : memref<40x128xf32, #tpu.memory_space<vmem>>, vector<40x128xf32>
    %cst = arith.constant dense<0.000000e+00> : vector<512x128xf32>
    %6 = tpu.matmul %4, %5, %cst {dimension_numbers = #tpu.dot_dimension_numbers<[1], [0], [0], [1], [0, 0, 1, 1], [], []>} : vector<512x40xf32>, vector<40x128xf32>, vector<512x128xf32> -> vector<512x128xf32>
    %7 = arith.addf %3, %6 : vector<512x128xf32>
    %c0_6 = arith.constant 0 : index
    %c0_7 = arith.constant 0 : index
    %8 = vector.load %arg7[%c0_6, %c0_7] : memref<512x128xf32, #tpu.memory_space<vmem>>, vector<512x128xf32>
    tpu.vector_store %arg7[%c0_6, %c0_7], %7 {strides = array<i32>} : memref<512x128xf32, #tpu.memory_space<vmem>>, vector<512x128xf32>,
    %c0_i32_8 = arith.constant 0 : i32
    %9 = arith.cmpi eq, %arg2, %c0_i32_8 : i32
    %10 = arith.extui %9 : i1 to i32
    %c0_i32_9 = arith.constant 0 : i32
    %11 = arith.cmpi ne, %10, %c0_i32_9 : i32
    scf.if %11 {
      %c0_10 = arith.constant 0 : index
      %c0_11 = arith.constant 0 : index
      %12 = vector.load %arg7[%c0_10, %c0_11] : memref<512x128xf32, #tpu.memory_space<vmem>>, vector<512x128xf32>
      %c0_12 = arith.constant 0 : index
      %c0_13 = arith.constant 0 : index
      %13 = vector.load %arg6[%c0_12, %c0_13] : memref<512x128xf32, #tpu.memory_space<vmem>>, vector<512x128xf32>
      tpu.vector_store %arg6[%c0_12, %c0_13], %12 {strides = array<i32>} : memref<512x128xf32, #tpu.memory_space<vmem>>, vector<512x128xf32>,
    } else {
    }
    return
  }
  func.func @transform_0(%arg0: i32, %arg1: i32, %arg2: i32) -> (i32, i32) {
    %c0_i32 = arith.constant 0 : i32
    return %arg0, %arg2 : i32, i32
  }
  func.func @transform_1(%arg0: i32, %arg1: i32, %arg2: i32) -> (i32, i32) {
    %c0_i32 = arith.constant 0 : i32
    return %arg2, %arg1 : i32, i32
  }
  func.func @transform_2(%arg0: i32, %arg1: i32, %arg2: i32) -> (i32, i32) {
    %c0_i32 = arith.constant 0 : i32
    %c0_i32_0 = arith.constant 0 : i32
    return %c0_i32, %arg1 : i32, i32
  }
  func.func @transform_3(%arg0: i32, %arg1: i32, %arg2: i32) -> (i32, i32) {
    %c0_i32 = arith.constant 0 : i32
    return %arg0, %arg1 : i32, i32
  }
}

</mosaic_0001>

<bundles_post_ra>
// kernel: tpu_custom_call.1
= control target key start
LH: loop header
LB: loop body
LE: loop exit
PB: predicated region body
PF: predicated region fallthrough
CT: control target
= control target key end

     0   :  { %vm223_vm0 = vcmask 326656   ;;  %s1732_s0 = inlined_call_operand.vmem [shape: f32[512,40], index: 0, kind: input, shape index: {}]   ;;  %s1733_s1 = inlined_call_operand.vmem [shape: f32[40,128], index: 1, kind: input, shape index: {}]   ;;  %s1734_s2 = inlined_call_operand.vmem [shape: f32[1,128], index: 2, kind: input, shape index: {}]   ;;  %s1735_s3 = inlined_call_operand.hbm [shape: f32[512,128], index: 3, kind: output, shape index: {}]  }
   0x1   :  { %v218_v0 = vld [vmem:[%s1733_s1] sm:$0xff]  ;;  %v219_v1 = vld [vmem:[%s1733_s1 + $0x8] sm:$0xff]  ;;  %v220_v2 = vld [vmem:[%s1733_s1 + $0x10] sm:$0xff] }
   0x2   :  { %v1316_v3 = vpack.c.bf16 %v219_v1, %v218_v0  ;;  %v221_v4 = vld [vmem:[%s1733_s1 + $0x18] sm:$0xff]  ;;  %v154_v5 = vld [vmem:[%s1732_s0] sm:$0xff]  ;;  %v155_v9 = vld [vmem:[%s1732_s0 + $0x8] sm:$0xff] }
   0x3   :  { %v1320_v6 = vpack.c.bf16 %v221_v4, %v220_v2  ;;  %1220 = vmatprep.mubr.msk.f32.mxu0 %vm223_vm0, %v154_v5  ;;  %v186_v7 = vld [vmem:[%s1732_s0 + $0x100] sm:$0xff]  ;;  %v187_v10 = vld [vmem:[%s1732_s0 + $0x108] sm:$0xff]  ;;  %v156_v11 = vld [vmem:[%s1732_s0 + $0x10] sm:$0xff] }
   0x4   :  { %1317 = vmatprep.subr.bf16.mxu0 %v1316_v3  ;;  %1324 = vmatprep.subr.bf16.mxu1 %v1316_v3  ;;  %v222_v8 = vld [vmem:[%s1733_s1 + $0x20] sm:$0xff]  ;;  %v188_v12 = vld [vmem:[%s1732_s0 + $0x110] sm:$0xff]  ;;  %v157_v13 = vld [vmem:[%s1732_s0 + $0x18] sm:$0xff] }
   0x5   :  { %1319 = vmatpush3.bf16.msra.mxu0 %v1316_v3  ;;  %1327 = vmatpush3.bf16.msra.mxu1 %v1316_v3  ;;  %v189_v14 = vld [vmem:[%s1732_s0 + $0x118] sm:$0xff]  ;;  %v158_v15 = vld [vmem:[%s1732_s0 + $0x20] sm:$0xff]  ;;  %v159_v17 = vld [vmem:[%s1732_s0 + $0x28] sm:$0xff] }
   0x6   :  { %1321 = vmatprep.subr.bf16.mxu0 %v1320_v6  ;;  %1325 = vmatprep.subr.bf16.mxu1 %v1320_v6  ;;  %v190_v16 = vld [vmem:[%s1732_s0 + $0x120] sm:$0xff]  ;;  %v191_v18 = vld [vmem:[%s1732_s0 + $0x128] sm:$0xff]  ;;  %v160_v19 = vld [vmem:[%s1732_s0 + $0x30] sm:$0xff] }
   0x7   :  { %1268 = vmatprep.mubr.msk.f32.mxu1 %vm223_vm0, %v186_v7  ;;  %v192_v20 = vld [vmem:[%s1732_s0 + $0x130] sm:$0xff]  ;;  %v161_v21 = vld [vmem:[%s1732_s0 + $0x38] sm:$0xff]  ;;  %v162_v23 = vld [vmem:[%s1732_s0 + $0x40] sm:$0xff] }
   0x8   :  { %v193_v22 = vld [vmem:[%s1732_s0 + $0x138] sm:$0xff]  ;;  %v194_v24 = vld [vmem:[%s1732_s0 + $0x140] sm:$0xff] }
   0x9   :  { %1323 = vmatpush3.bf16.msra.mxu0 %v1320_v6  ;;  %1328 = vmatpush3.bf16.msra.mxu1 %v1320_v6 }
   0xa   :  { %1218 = vmatprep.subr.mxu0 %v222_v8  ;;  %1326 = vmatprep.subr.mxu1 %v222_v8 }
   0xd   :  { %1219 = vmatpush3.msra.mxu0 %v222_v8  ;;  %1329 = vmatpush3.msra.mxu1 %v222_v8 }
   0xe   :  { %1221 = vmatmul.mubr.msk.f32.vlgmr.msra.gmra.mrb[0].mxu0 %vm223_vm0, %v155_v9  ;;  %1269 = vmatmul.mubr.msk.f32.vlgmr.msra.gmra.mrb[0].mxu1 %vm223_vm0, %v187_v10 }
   0xf   :  { %1223 = vmatprep.mubr.msk.f32.mxu0 %vm223_vm0, %v156_v11  ;;  %1271 = vmatprep.mubr.msk.f32.mxu1 %vm223_vm0, %v188_v12 }
  0x12   :  { %1224 = vmatmul.mubr.msk.f32.gmra.mrb[2].mxu0 %vm223_vm0, %v157_v13  ;;  %1272 = vmatmul.mubr.msk.f32.gmra.mrb[2].mxu1 %vm223_vm0, %v189_v14 }
  0x13   :  { %1226 = vmatprep.mubr.msk.f32.mxu0 %vm223_vm0, %v158_v15  ;;  %1274 = vmatprep.mubr.msk.f32.mxu1 %vm223_vm0, %v190_v16 }
  0x16   :  { %1227 = vmatmul.mubr.msk.f32.gmra.mrb[4].mxu0 %vm223_vm0, %v159_v17  ;;  %1275 = vmatmul.mubr.msk.f32.gmra.mrb[4].mxu1 %vm223_vm0, %v191_v18 }
  0x17   :  { %1229 = vmatprep.mubr.msk.f32.mxu0 %vm223_vm0, %v160_v19  ;;  %1277 = vmatprep.mubr.msk.f32.mxu1 %vm223_vm0, %v192_v20 }
  0x18   :  { %8 = vsyncpa [#allocation4], 0  ;;  %v163_v25 = vld [vmem:[%s1732_s0 + $0x48] sm:$0xff]  ;;  %v164_v27 = vld [vmem:[%s1732_s0 + $0x50] sm:$0xff] }
  0x19   :  { %v195_v26 = vld [vmem:[%s1732_s0 + $0x148] sm:$0xff]  ;;  %v196_v28 = vld [vmem:[%s1732_s0 + $0x150] sm:$0xff]  ;;  %v165_v29 = vld [vmem:[%s1732_s0 + $0x58] sm:$0xff] }
  0x1a   :  { %1230 = vmatmul.mubr.msk.f32.gmra.mrb[6].mxu0 %vm223_vm0, %v161_v21  ;;  %1278 = vmatmul.mubr.msk.f32.gmra.mrb[6].mxu1 %vm223_vm0, %v193_v22  ;;  %v197_v30 = vld [vmem:[%s1732_s0 + $0x158] sm:$0xff]  ;;  %v166_v31 = vld [vmem:[%s1732_s0 + $0x60] sm:$0xff]  ;;  %v167_v33 = vld [vmem:[%s1732_s0 + $0x68] sm:$0xff] }
  0x1b   :  { %1232 = vmatprep.mubr.msk.f32.mxu0 %vm223_vm0, %v162_v23  ;;  %1280 = vmatprep.mubr.msk.f32.mxu1 %vm223_vm0, %v194_v24  ;;  %v198_v32 = vld [vmem:[%s1732_s0 + $0x160] sm:$0xff]  ;;  %v199_v34 = vld [vmem:[%s1732_s0 + $0x168] sm:$0xff]  ;;  %v168_v35 = vld [vmem:[%s1732_s0 + $0x70] sm:$0xff] }
  0x1c   :  { %v200_v36 = vld [vmem:[%s1732_s0 + $0x170] sm:$0xff]  ;;  %v169_v37 = vld [vmem:[%s1732_s0 + $0x78] sm:$0xff]  ;;  %v170_v39 = vld [vmem:[%s1732_s0 + $0x80] sm:$0xff] }
  0x1d   :  { %v201_v38 = vld [vmem:[%s1732_s0 + $0x178] sm:$0xff]  ;;  %v202_v40 = vld [vmem:[%s1732_s0 + $0x180] sm:$0xff]  ;;  %v171_v41 = vld [vmem:[%s1732_s0 + $0x88] sm:$0xff] }
  0x1e   :  { %1233 = vmatmul.mubr.msk.f32.gmra.mrb[8].mxu0 %vm223_vm0, %v163_v25  ;;  %1281 = vmatmul.mubr.msk.f32.gmra.mrb[8].mxu1 %vm223_vm0, %v195_v26  ;;  %v203_v42 = vld [vmem:[%s1732_s0 + $0x188] sm:$0xff]  ;;  %v172_v43 = vld [vmem:[%s1732_s0 + $0x90] sm:$0xff]  ;;  %v173_v45 = vld [vmem:[%s1732_s0 + $0x98] sm:$0xff] }
  0x1f   :  { %1235 = vmatprep.mubr.msk.f32.mxu0 %vm223_vm0, %v164_v27  ;;  %1283 = vmatprep.mubr.msk.f32.mxu1 %vm223_vm0, %v196_v28  ;;  %v204_v44 = vld [vmem:[%s1732_s0 + $0x190] sm:$0xff]  ;;  %v205_v46 = vld [vmem:[%s1732_s0 + $0x198] sm:$0xff]  ;;  %v174_v47 = vld [vmem:[%s1732_s0 + $0xa0] sm:$0xff] }
  0x20   :  { %v206_v48 = vld [vmem:[%s1732_s0 + $0x1a0] sm:$0xff]  ;;  %v175_v49 = vld [vmem:[%s1732_s0 + $0xa8] sm:$0xff]  ;;  %v176_v51 = vld [vmem:[%s1732_s0 + $0xb0] sm:$0xff] }
  0x21   :  { %v207_v50 = vld [vmem:[%s1732_s0 + $0x1a8] sm:$0xff]  ;;  %v208_v52 = vld [vmem:[%s1732_s0 + $0x1b0] sm:$0xff]  ;;  %v177_v53 = vld [vmem:[%s1732_s0 + $0xb8] sm:$0xff] }
  0x22   :  { %1236 = vmatmul.mubr.msk.f32.gmra.mrb[10].mxu0 %vm223_vm0, %v165_v29  ;;  %1284 = vmatmul.mubr.msk.f32.gmra.mrb[10].mxu1 %vm223_vm0, %v197_v30  ;;  %v209_v54 = vld [vmem:[%s1732_s0 + $0x1b8] sm:$0xff]  ;;  %v178_v55 = vld [vmem:[%s1732_s0 + $0xc0] sm:$0xff]  ;;  %v179_v57 = vld [vmem:[%s1732_s0 + $0xc8] sm:$0xff] }
  0x23   :  { %1238 = vmatprep.mubr.msk.f32.mxu0 %vm223_vm0, %v166_v31  ;;  %1286 = vmatprep.mubr.msk.f32.mxu1 %vm223_vm0, %v198_v32  ;;  %v210_v56 = vld [vmem:[%s1732_s0 + $0x1c0] sm:$0xff]  ;;  %v211_v58 = vld [vmem:[%s1732_s0 + $0x1c8] sm:$0xff]  ;;  %v180_v59 = vld [vmem:[%s1732_s0 + $0xd0] sm:$0xff] }
  0x24   :  { %v212_v60 = vld [vmem:[%s1732_s0 + $0x1d0] sm:$0xff]  ;;  %v181_v61 = vld [vmem:[%s1732_s0 + $0xd8] sm:$0xff]  ;;  %v182_v63 = vld [vmem:[%s1732_s0 + $0xe0] sm:$0xff] }
  0x25   :  { %v213_v62 = vld [vmem:[%s1732_s0 + $0x1d8] sm:$0xff]  ;;  %v214_v0 = vld [vmem:[%s1732_s0 + $0x1e0] sm:$0xff]  ;;  %v183_v1 = vld [vmem:[%s1732_s0 + $0xe8] sm:$0xff] }
  0x26   :  { %1239 = vmatmul.mubr.msk.f32.gmra.mrb[12].mxu0 %vm223_vm0, %v167_v33  ;;  %1287 = vmatmul.mubr.msk.f32.gmra.mrb[12].mxu1 %vm223_vm0, %v199_v34  ;;  %v215_v2 = vld [vmem:[%s1732_s0 + $0x1e8] sm:$0xff]  ;;  %v184_v3 = vld [vmem:[%s1732_s0 + $0xf0] sm:$0xff]  ;;  %v185_v5 = vld [vmem:[%s1732_s0 + $0xf8] sm:$0xff] }
  0x27   :  { %1241 = vmatprep.mubr.msk.f32.mxu0 %vm223_vm0, %v168_v35  ;;  %1289 = vmatprep.mubr.msk.f32.mxu1 %vm223_vm0, %v200_v36  ;;  %v216_v4 = vld [vmem:[%s1732_s0 + $0x1f0] sm:$0xff]  ;;  %v217_v6 = vld [vmem:[%s1732_s0 + $0x1f8] sm:$0xff]  ;;  %v1654_v7 = vld [vmem:[%s1734_s2] ss:$0 sm:$0xff]  ;;  %s1357_s0 = smov [#allocation3]  }
  0x28   :  { %s1065_s2 = sshll.u32 %s1357_s0, 4  ;;  %s1066_s2 = int_to_ptr.vmem [resolvable:$true] %s1065_s2 }
  0x29   :  { %s1333_s12 = scalar_lea.vmem %s1066_s2, 8192  ;;  %p1338_p1 = scmp.lt.s32.totalorder %s1066_s2, %s1066_s2 }
  0x2a   :  { %1242 = vmatmul.mubr.msk.f32.gmra.mrb[14].mxu0 %vm223_vm0, %v169_v37  ;;  %1290 = vmatmul.mubr.msk.f32.gmra.mrb[14].mxu1 %vm223_vm0, %v201_v38  ;;  %p1334_p0 = scmp.ne.s32.totalorder %s1066_s2, %s1333_s12  ;;  %p1339_p2 = scmp.lt.s32.totalorder %s1333_s12, %s1333_s12 }
  0x2b   :  { %1244 = vmatprep.mubr.msk.f32.mxu0 %vm223_vm0, %v170_v39  ;;  %1292 = vmatprep.mubr.msk.f32.mxu1 %vm223_vm0, %v202_v40 }
  0x2c   :  { %p1340_p3 = por %p1339_p2, %p1338_p1 }
  0x2e   :  { %1245 = vmatmul.mubr.msk.f32.gmra.mrb[16].mxu0 %vm223_vm0, %v171_v41  ;;  %1293 = vmatmul.mubr.msk.f32.gmra.mrb[16].mxu1 %vm223_vm0, %v203_v42  ;;  %p1341_p4 = pnand %p1340_p3, %p1334_p0 }
  0x2f   :  { %1247 = vmatprep.mubr.msk.f32.mxu0 %vm223_vm0, %v172_v43  ;;  %1295 = vmatprep.mubr.msk.f32.mxu1 %vm223_vm0, %v204_v44 }
  0x32   :  { %1248 = vmatmul.mubr.msk.f32.gmra.mrb[18].mxu0 %vm223_vm0, %v173_v45  ;;  %1296 = vmatmul.mubr.msk.f32.gmra.mrb[18].mxu1 %vm223_vm0, %v205_v46 }
  0x33   :  { %1250 = vmatprep.mubr.msk.f32.mxu0 %vm223_vm0, %v174_v47  ;;  %1298 = vmatprep.mubr.msk.f32.mxu1 %vm223_vm0, %v206_v48 }
  0x36   :  { %1251 = vmatmul.mubr.msk.f32.gmra.mrb[20].mxu0 %vm223_vm0, %v175_v49  ;;  %1299 = vmatmul.mubr.msk.f32.gmra.mrb[20].mxu1 %vm223_vm0, %v207_v50 }
  0x37   :  { %1253 = vmatprep.mubr.msk.f32.mxu0 %vm223_vm0, %v176_v51  ;;  %1301 = vmatprep.mubr.msk.f32.mxu1 %vm223_vm0, %v208_v52 }
  0x3a   :  { %1254 = vmatmul.mubr.msk.f32.gmra.mrb[22].mxu0 %vm223_vm0, %v177_v53  ;;  %1302 = vmatmul.mubr.msk.f32.gmra.mrb[22].mxu1 %vm223_vm0, %v209_v54 }
  0x3b   :  { %1256 = vmatprep.mubr.msk.f32.mxu0 %vm223_vm0, %v178_v55  ;;  %1304 = vmatprep.mubr.msk.f32.mxu1 %vm223_vm0, %v210_v56 }
  0x3e   :  { %1257 = vmatmul.mubr.msk.f32.gmra.mrb[24].mxu0 %vm223_vm0, %v179_v57  ;;  %1305 = vmatmul.mubr.msk.f32.gmra.mrb[24].mxu1 %vm223_vm0, %v211_v58 }
  0x3f   :  { %1259 = vmatprep.mubr.msk.f32.mxu0 %vm223_vm0, %v180_v59  ;;  %1307 = vmatprep.mubr.msk.f32.mxu1 %vm223_vm0, %v212_v60 }
  0x42   :  { %1260 = vmatmul.mubr.msk.f32.gmra.mrb[26].mxu0 %vm223_vm0, %v181_v61  ;;  %1308 = vmatmul.mubr.msk.f32.gmra.mrb[26].mxu1 %vm223_vm0, %v213_v62 }
  0x43   :  { %1262 = vmatprep.mubr.msk.f32.mxu0 %vm223_vm0, %v182_v63  ;;  %1310 = vmatprep.mubr.msk.f32.mxu1 %vm223_vm0, %v214_v0 }
  0x46   :  { %1263 = vmatmul.mubr.msk.f32.gmra.mrb[28].mxu0 %vm223_vm0, %v183_v1  ;;  %1311 = vmatmul.mubr.msk.f32.gmra.mrb[28].mxu1 %vm223_vm0, %v215_v2 }
  0x47   :  { %1265 = vmatprep.mubr.msk.f32.mxu0 %vm223_vm0, %v184_v3  ;;  %1313 = vmatprep.mubr.msk.f32.mxu1 %vm223_vm0, %v216_v4 }
  0x4a   :  { %1266 = vmatmul.mubr.msk.f32.gmra.mrb[30].mxu0 %vm223_vm0, %v185_v5  ;;  %1314 = vmatmul.mubr.msk.f32.gmra.mrb[30].mxu1 %vm223_vm0, %v217_v6 }
  0xe1   :  { %v1222_v8 = vpop.f32.mrb[0].mxu0  ;;  %v1270_v9 = vpop.f32.mrb[0].mxu1 }
  0xe2   :  { %v802_v10 = vadd.f32 %v1222_v8, %v1654_v7  ;;  %v834_v11 = vadd.f32 %v1270_v9, %v1654_v7  ;;  %v482_v12 = vpop.f32.mrb[1].mxu0  ;;  %v642_v13 = vpop.f32.mrb[1].mxu1 }
  0xe3   :  { %v801_v14 = vadd.f32 %v1654_v7, %v482_v12  ;;  %v833_v15 = vadd.f32 %v1654_v7, %v642_v13 }
  0xe4   :  { %997 = vst [vmem:[#allocation3 + $0x8] sm:$0xff] %v802_v10  ;;  %1029 = vst [vmem:[#allocation3 + $0x108] sm:$0xff] %v834_v11 }
  0xe5   :  { %996 = vst [vmem:[#allocation3] sm:$0xff] %v801_v14  ;;  %1028 = vst [vmem:[#allocation3 + $0x100] sm:$0xff] %v833_v15  ;;  %v1225_v16 = vpop.f32.mrb[2].mxu0  ;;  %v1273_v17 = vpop.f32.mrb[2].mxu1 }
  0xe6   :  { %v804_v18 = vadd.f32 %v1225_v16, %v1654_v7  ;;  %v836_v19 = vadd.f32 %v1273_v17, %v1654_v7  ;;  %v492_v20 = vpop.f32.mrb[3].mxu0  ;;  %v652_v21 = vpop.f32.mrb[3].mxu1 }
  0xe7   :  { %v803_v22 = vadd.f32 %v1654_v7, %v492_v20  ;;  %v835_v23 = vadd.f32 %v1654_v7, %v652_v21 }
  0xe8   :  { %999 = vst [vmem:[#allocation3 + $0x18] sm:$0xff] %v804_v18  ;;  %1031 = vst [vmem:[#allocation3 + $0x118] sm:$0xff] %v836_v19 }
  0xe9   :  { %998 = vst [vmem:[#allocation3 + $0x10] sm:$0xff] %v803_v22  ;;  %1030 = vst [vmem:[#allocation3 + $0x110] sm:$0xff] %v835_v23  ;;  %v1228_v24 = vpop.f32.mrb[4].mxu0  ;;  %v1276_v25 = vpop.f32.mrb[4].mxu1 }
  0xea   :  { %v806_v26 = vadd.f32 %v1228_v24, %v1654_v7  ;;  %v838_v27 = vadd.f32 %v1276_v25, %v1654_v7  ;;  %v502_v28 = vpop.f32.mrb[5].mxu0  ;;  %v662_v29 = vpop.f32.mrb[5].mxu1 }
  0xeb   :  { %v805_v30 = vadd.f32 %v1654_v7, %v502_v28  ;;  %v837_v31 = vadd.f32 %v1654_v7, %v662_v29 }
  0xec   :  { %1001 = vst [vmem:[#allocation3 + $0x28] sm:$0xff] %v806_v26  ;;  %1033 = vst [vmem:[#allocation3 + $0x128] sm:$0xff] %v838_v27 }
  0xed   :  { %1000 = vst [vmem:[#allocation3 + $0x20] sm:$0xff] %v805_v30  ;;  %1032 = vst [vmem:[#allocation3 + $0x120] sm:$0xff] %v837_v31  ;;  %v1231_v32 = vpop.f32.mrb[6].mxu0  ;;  %v1279_v33 = vpop.f32.mrb[6].mxu1 }
  0xee   :  { %v808_v34 = vadd.f32 %v1231_v32, %v1654_v7  ;;  %v840_v35 = vadd.f32 %v1279_v33, %v1654_v7  ;;  %v512_v36 = vpop.f32.mrb[7].mxu0  ;;  %v672_v37 = vpop.f32.mrb[7].mxu1 }
  0xef   :  { %v807_v38 = vadd.f32 %v1654_v7, %v512_v36  ;;  %v839_v39 = vadd.f32 %v1654_v7, %v672_v37 }
  0xf0   :  { %1003 = vst [vmem:[#allocation3 + $0x38] sm:$0xff] %v808_v34  ;;  %1035 = vst [vmem:[#allocation3 + $0x138] sm:$0xff] %v840_v35 }
  0xf1   :  { %1002 = vst [vmem:[#allocation3 + $0x30] sm:$0xff] %v807_v38  ;;  %1034 = vst [vmem:[#allocation3 + $0x130] sm:$0xff] %v839_v39  ;;  %v1234_v40 = vpop.f32.mrb[8].mxu0  ;;  %v1282_v41 = vpop.f32.mrb[8].mxu1 }
  0xf2   :  { %v810_v42 = vadd.f32 %v1234_v40, %v1654_v7  ;;  %v842_v43 = vadd.f32 %v1282_v41, %v1654_v7  ;;  %v522_v44 = vpop.f32.mrb[9].mxu0  ;;  %v682_v45 = vpop.f32.mrb[9].mxu1 }
  0xf3   :  { %v809_v46 = vadd.f32 %v1654_v7, %v522_v44  ;;  %v841_v47 = vadd.f32 %v1654_v7, %v682_v45 }
  0xf4   :  { %1005 = vst [vmem:[#allocation3 + $0x48] sm:$0xff] %v810_v42  ;;  %1037 = vst [vmem:[#allocation3 + $0x148] sm:$0xff] %v842_v43 }
  0xf5   :  { %1004 = vst [vmem:[#allocation3 + $0x40] sm:$0xff] %v809_v46  ;;  %1036 = vst [vmem:[#allocation3 + $0x140] sm:$0xff] %v841_v47  ;;  %v1237_v48 = vpop.f32.mrb[10].mxu0  ;;  %v1285_v49 = vpop.f32.mrb[10].mxu1 }
  0xf6   :  { %v812_v50 = vadd.f32 %v1237_v48, %v1654_v7  ;;  %v844_v51 = vadd.f32 %v1285_v49, %v1654_v7  ;;  %v532_v52 = vpop.f32.mrb[11].mxu0  ;;  %v692_v53 = vpop.f32.mrb[11].mxu1 }
  0xf7   :  { %v811_v54 = vadd.f32 %v1654_v7, %v532_v52  ;;  %v843_v55 = vadd.f32 %v1654_v7, %v692_v53 }
  0xf8   :  { %1007 = vst [vmem:[#allocation3 + $0x58] sm:$0xff] %v812_v50  ;;  %1039 = vst [vmem:[#allocation3 + $0x158] sm:$0xff] %v844_v51 }
  0xf9   :  { %1006 = vst [vmem:[#allocation3 + $0x50] sm:$0xff] %v811_v54  ;;  %1038 = vst [vmem:[#allocation3 + $0x150] sm:$0xff] %v843_v55  ;;  %v1240_v56 = vpop.f32.mrb[12].mxu0  ;;  %v1288_v57 = vpop.f32.mrb[12].mxu1 }
  0xfa   :  { %v814_v58 = vadd.f32 %v1240_v56, %v1654_v7  ;;  %v846_v59 = vadd.f32 %v1288_v57, %v1654_v7  ;;  %v542_v60 = vpop.f32.mrb[13].mxu0  ;;  %v702_v61 = vpop.f32.mrb[13].mxu1 }
  0xfb   :  { %v813_v62 = vadd.f32 %v1654_v7, %v542_v60  ;;  %v845_v63 = vadd.f32 %v1654_v7, %v702_v61 }
  0xfc   :  { %1009 = vst [vmem:[#allocation3 + $0x68] sm:$0xff] %v814_v58  ;;  %1041 = vst [vmem:[#allocation3 + $0x168] sm:$0xff] %v846_v59 }
  0xfd   :  { %1008 = vst [vmem:[#allocation3 + $0x60] sm:$0xff] %v813_v62  ;;  %1040 = vst [vmem:[#allocation3 + $0x160] sm:$0xff] %v845_v63  ;;  %v1243_v0 = vpop.f32.mrb[14].mxu0  ;;  %v1291_v1 = vpop.f32.mrb[14].mxu1 }
  0xfe   :  { %v816_v2 = vadd.f32 %v1243_v0, %v1654_v7  ;;  %v848_v3 = vadd.f32 %v1291_v1, %v1654_v7  ;;  %v552_v4 = vpop.f32.mrb[15].mxu0  ;;  %v712_v5 = vpop.f32.mrb[15].mxu1 }
  0xff   :  { %v815_v6 = vadd.f32 %v1654_v7, %v552_v4  ;;  %v847_v8 = vadd.f32 %v1654_v7, %v712_v5 }
 0x100   :  { %1011 = vst [vmem:[#allocation3 + $0x78] sm:$0xff] %v816_v2  ;;  %1043 = vst [vmem:[#allocation3 + $0x178] sm:$0xff] %v848_v3 }
 0x101   :  { %1010 = vst [vmem:[#allocation3 + $0x70] sm:$0xff] %v815_v6  ;;  %1042 = vst [vmem:[#allocation3 + $0x170] sm:$0xff] %v847_v8  ;;  %v1246_v9 = vpop.f32.mrb[16].mxu0  ;;  %v1294_v10 = vpop.f32.mrb[16].mxu1 }
 0x102   :  { %v818_v11 = vadd.f32 %v1246_v9, %v1654_v7  ;;  %v850_v12 = vadd.f32 %v1294_v10, %v1654_v7  ;;  %v562_v13 = vpop.f32.mrb[17].mxu0  ;;  %v722_v14 = vpop.f32.mrb[17].mxu1 }
 0x103   :  { %v817_v15 = vadd.f32 %v1654_v7, %v562_v13  ;;  %v849_v16 = vadd.f32 %v1654_v7, %v722_v14 }
 0x104   :  { %1013 = vst [vmem:[#allocation3 + $0x88] sm:$0xff] %v818_v11  ;;  %1045 = vst [vmem:[#allocation3 + $0x188] sm:$0xff] %v850_v12 }
 0x105   :  { %1012 = vst [vmem:[#allocation3 + $0x80] sm:$0xff] %v817_v15  ;;  %1044 = vst [vmem:[#allocation3 + $0x180] sm:$0xff] %v849_v16  ;;  %v1249_v17 = vpop.f32.mrb[18].mxu0  ;;  %v1297_v18 = vpop.f32.mrb[18].mxu1 }
 0x106   :  { %v820_v19 = vadd.f32 %v1249_v17, %v1654_v7  ;;  %v852_v20 = vadd.f32 %v1297_v18, %v1654_v7  ;;  %v572_v21 = vpop.f32.mrb[19].mxu0  ;;  %v732_v22 = vpop.f32.mrb[19].mxu1 }
 0x107   :  { %v819_v23 = vadd.f32 %v1654_v7, %v572_v21  ;;  %v851_v24 = vadd.f32 %v1654_v7, %v732_v22 }
 0x108   :  { %1015 = vst [vmem:[#allocation3 + $0x98] sm:$0xff] %v820_v19  ;;  %1047 = vst [vmem:[#allocation3 + $0x198] sm:$0xff] %v852_v20 }
 0x109   :  { %1014 = vst [vmem:[#allocation3 + $0x90] sm:$0xff] %v819_v23  ;;  %1046 = vst [vmem:[#allocation3 + $0x190] sm:$0xff] %v851_v24  ;;  %v1252_v25 = vpop.f32.mrb[20].mxu0  ;;  %v1300_v26 = vpop.f32.mrb[20].mxu1 }
 0x10a   :  { %v822_v27 = vadd.f32 %v1252_v25, %v1654_v7  ;;  %v854_v28 = vadd.f32 %v1300_v26, %v1654_v7  ;;  %v582_v29 = vpop.f32.mrb[21].mxu0  ;;  %v742_v30 = vpop.f32.mrb[21].mxu1 }
 0x10b   :  { %v821_v31 = vadd.f32 %v1654_v7, %v582_v29  ;;  %v853_v32 = vadd.f32 %v1654_v7, %v742_v30 }
 0x10c   :  { %1017 = vst [vmem:[#allocation3 + $0xa8] sm:$0xff] %v822_v27  ;;  %1049 = vst [vmem:[#allocation3 + $0x1a8] sm:$0xff] %v854_v28 }
 0x10d   :  { %1016 = vst [vmem:[#allocation3 + $0xa0] sm:$0xff] %v821_v31  ;;  %1048 = vst [vmem:[#allocation3 + $0x1a0] sm:$0xff] %v853_v32  ;;  %v1255_v33 = vpop.f32.mrb[22].mxu0  ;;  %v1303_v34 = vpop.f32.mrb[22].mxu1 }
 0x10e   :  { %v824_v35 = vadd.f32 %v1255_v33, %v1654_v7  ;;  %v856_v36 = vadd.f32 %v1303_v34, %v1654_v7  ;;  %v592_v37 = vpop.f32.mrb[23].mxu0  ;;  %v752_v38 = vpop.f32.mrb[23].mxu1 }
 0x10f   :  { %v823_v39 = vadd.f32 %v1654_v7, %v592_v37  ;;  %v855_v40 = vadd.f32 %v1654_v7, %v752_v38 }
 0x110   :  { %1019 = vst [vmem:[#allocation3 + $0xb8] sm:$0xff] %v824_v35  ;;  %1051 = vst [vmem:[#allocation3 + $0x1b8] sm:$0xff] %v856_v36 }
 0x111   :  { %1018 = vst [vmem:[#allocation3 + $0xb0] sm:$0xff] %v823_v39  ;;  %1050 = vst [vmem:[#allocation3 + $0x1b0] sm:$0xff] %v855_v40  ;;  %v1258_v41 = vpop.f32.mrb[24].mxu0  ;;  %v1306_v42 = vpop.f32.mrb[24].mxu1 }
 0x112   :  { %v826_v43 = vadd.f32 %v1258_v41, %v1654_v7  ;;  %v858_v44 = vadd.f32 %v1306_v42, %v1654_v7  ;;  %v602_v45 = vpop.f32.mrb[25].mxu0  ;;  %v762_v46 = vpop.f32.mrb[25].mxu1 }
 0x113   :  { %v825_v47 = vadd.f32 %v1654_v7, %v602_v45  ;;  %v857_v48 = vadd.f32 %v1654_v7, %v762_v46 }
 0x114   :  { %1021 = vst [vmem:[#allocation3 + $0xc8] sm:$0xff] %v826_v43  ;;  %1053 = vst [vmem:[#allocation3 + $0x1c8] sm:$0xff] %v858_v44 }
 0x115   :  { %1020 = vst [vmem:[#allocation3 + $0xc0] sm:$0xff] %v825_v47  ;;  %1052 = vst [vmem:[#allocation3 + $0x1c0] sm:$0xff] %v857_v48  ;;  %v1261_v49 = vpop.f32.mrb[26].mxu0  ;;  %v1309_v50 = vpop.f32.mrb[26].mxu1 }
 0x116   :  { %v828_v51 = vadd.f32 %v1261_v49, %v1654_v7  ;;  %v860_v52 = vadd.f32 %v1309_v50, %v1654_v7  ;;  %v612_v53 = vpop.f32.mrb[27].mxu0  ;;  %v772_v54 = vpop.f32.mrb[27].mxu1 }
 0x117   :  { %v827_v55 = vadd.f32 %v1654_v7, %v612_v53  ;;  %v859_v56 = vadd.f32 %v1654_v7, %v772_v54 }
 0x118   :  { %1023 = vst [vmem:[#allocation3 + $0xd8] sm:$0xff] %v828_v51  ;;  %1055 = vst [vmem:[#allocation3 + $0x1d8] sm:$0xff] %v860_v52 }
 0x119   :  { %1022 = vst [vmem:[#allocation3 + $0xd0] sm:$0xff] %v827_v55  ;;  %1054 = vst [vmem:[#allocation3 + $0x1d0] sm:$0xff] %v859_v56  ;;  %v1264_v57 = vpop.f32.mrb[28].mxu0  ;;  %v1312_v58 = vpop.f32.mrb[28].mxu1 }
 0x11a   :  { %v830_v59 = vadd.f32 %v1264_v57, %v1654_v7  ;;  %v862_v60 = vadd.f32 %v1312_v58, %v1654_v7  ;;  %v622_v61 = vpop.f32.mrb[29].mxu0  ;;  %v782_v62 = vpop.f32.mrb[29].mxu1 }
 0x11b   :  { %v829_v63 = vadd.f32 %v1654_v7, %v622_v61  ;;  %v861_v0 = vadd.f32 %v1654_v7, %v782_v62 }
 0x11c   :  { %1025 = vst [vmem:[#allocation3 + $0xe8] sm:$0xff] %v830_v59  ;;  %1057 = vst [vmem:[#allocation3 + $0x1e8] sm:$0xff] %v862_v60 }
 0x11d   :  { %1024 = vst [vmem:[#allocation3 + $0xe0] sm:$0xff] %v829_v63  ;;  %1056 = vst [vmem:[#allocation3 + $0x1e0] sm:$0xff] %v861_v0  ;;  %v1267_v1 = vpop.f32.mrb[30].mxu0  ;;  %v1315_v2 = vpop.f32.mrb[30].mxu1 }
 0x11e   :  { %v832_v3 = vadd.f32 %v1267_v1, %v1654_v7  ;;  %v864_v4 = vadd.f32 %v1315_v2, %v1654_v7  ;;  %v632_v5 = vpop.f32.mrb[31].mxu0  ;;  %v792_v6 = vpop.f32.mrb[31].mxu1 }
 0x11f   :  { %v831_v8 = vadd.f32 %v1654_v7, %v632_v5  ;;  %v863_v9 = vadd.f32 %v1654_v7, %v792_v6 }
 0x120   :  { %1027 = vst [vmem:[#allocation3 + $0xf8] sm:$0xff] %v832_v3  ;;  %1059 = vst [vmem:[#allocation3 + $0x1f8] sm:$0xff] %v864_v4 }
 0x121   :  { %1026 = vst [vmem:[#allocation3 + $0xf0] sm:$0xff] %v831_v8  ;;  %1058 = vst [vmem:[#allocation3 + $0x1f0] sm:$0xff] %v863_v9 }
 0x122   :  { %1344 = shalt.err (!%p1341_p4)
}
 0x123   :  { %s1345_s15 = scalar_lea.hbm %s1735_s3, 8192 }
 0x124   :  { %p1346_p5 = scmp.ne.s32.totalorder %s1735_s3, %s1345_s15  ;;  %p1349_p6 = scmp.lt.u32.totalorder %s1345_s15, %s1735_s3 }
 0x126   :  { %p1351_p7 = pnand %p1349_p6, %p1346_p5 }
 0x128   :  { %1354 = shalt.err (!%p1351_p7)
}
 0x129   :  { %s1358_s20 = smov 128   ;;  %s1359_s21 = smov 8  }
 0x12a   :  { %1071 = dma.vmem_to_hbm [thread:$0]  %s1066_s2, 8192, %s1735_s3, [#allocation4], %s1358_s20, %s1358_s20, %s1359_s21  }
 0x12b   :  { %1355 = dma.done.wait [#allocation4], 8192  }
 0x12c   :  { %1356 = vsyncadd [#allocation4], 4294959104 }
 0x12d   :  { %1075 = vsyncpa [#allocation4], 1 }

</bundles_post_ra>
